<compile_context>
chip_gen: v7x
topology: tpu7x:2x2x1
jax: 0.10.0
libtpu: 0.0.40
codegen_flags: <defaults>
</compile_context>

<pallas_src>
import functools

import jax
import jax.numpy as jnp
from jax import lax
from jax.experimental import pallas as pl
from jax.experimental.pallas import tpu as pltpu

# ---------------- config (small, consistent with the module's __init__) ----------------
HIDDEN = 32
NUM_HEADS = 4
HEAD_DIM = HIDDEN // NUM_HEADS          # 8
NUM_KV_HEADS = 2                        # GQA: num_key_value_heads
KV_GROUPS = NUM_HEADS // NUM_KV_HEADS   # repeat_kv factor
ROPE_THETA = 10000.0
BATCH = 2
SEQ = 8
MASK_MIN = -1e9


# ---------------------------- fused Pallas kernel ----------------------------
def fused_llama_attention_kernel(x_ref, wqkv_ref, wo_ref, cos_ref, sin_ref, o_ref, *,
                                 batch, seq, num_heads, num_kv_heads, head_dim):
    groups = num_heads // num_kv_heads
    scale = 1.0 / (head_dim ** 0.5)
    q_sz = num_heads * head_dim
    kv_sz = num_kv_heads * head_dim

    x = x_ref[...]                                   # (B*S, H) f32
    wqkv = wqkv_ref[...]                             # (q_sz + 2*kv_sz, H)

    # Fused QKV projection: one MXU pass, y = x @ W_qkv.T
    qkv = lax.dot_general(x, wqkv, (((1,), (1,)), ((), ())),
                          preferred_element_type=jnp.float32)       # (B*S, q_sz+2*kv_sz)
    q2 = qkv[:, :q_sz]                                              # (B*S, NH*D)
    k2 = qkv[:, q_sz:q_sz + kv_sz]                                  # (B*S, NKV*D)
    v2 = qkv[:, q_sz + kv_sz:]                                      # (B*S, NKV*D)

    cos = cos_ref[...]                                              # (S, D) f32
    sin = sin_ref[...]

    half = head_dim // 2

    def rope(t):  # t: (S, D); x*cos + rotate_half(x)*sin, rotate_half = half-swap + sign
        rot = jnp.concatenate([-t[:, half:], t[:, :half]], axis=-1)
        return t * cos + rot * sin

    # Causal mask built in-kernel (no HBM mask DMA, no per-step VMEM mask tile).
    row = lax.broadcasted_iota(jnp.int32, (seq, seq), 0)
    col = lax.broadcasted_iota(jnp.int32, (seq, seq), 1)
    causal = col <= row

    out_rows = []
    for b in range(batch):                 # tiny static loops: fully unrolled at trace time
        r0 = b * seq
        xq = q2[r0:r0 + seq, :]
        xk = k2[r0:r0 + seq, :]
        xv = v2[r0:r0 + seq, :]

        # RoPE K once per KV head (not once per query head).
        k_rot = [rope(xk[:, j * head_dim:(j + 1) * head_dim]) for j in range(num_kv_heads)]

        head_outs = []
        for h in range(num_heads):
            j = h // groups                                          # GQA sharing
            qh = rope(xq[:, h * head_dim:(h + 1) * head_dim])        # (S, D)
            kh = k_rot[j]                                            # (S, D)
            vh = xv[:, j * head_dim:(j + 1) * head_dim]              # (S, D)

            s = lax.dot_general(qh, kh, (((1,), (1,)), ((), ())),
                                preferred_element_type=jnp.float32) * scale
            s = jnp.where(causal, s, MASK_MIN)

            # fp32 softmax (matches HF upcast); divide replaced by EUP approx reciprocal.
            m = jnp.max(s, axis=-1, keepdims=True)
            p = jnp.exp(s - m)
            denom = jnp.sum(p, axis=-1, keepdims=True)
            p = p * pl.reciprocal(denom, approx=True)

            head_outs.append(jnp.dot(p, vh, preferred_element_type=jnp.float32))
        out_rows.append(jnp.concatenate(head_outs, axis=-1))         # (S, NH*D) lane-dense

    attn = jnp.concatenate(out_rows, axis=0)                         # (B*S, NH*D)

    # Fused output projection: y = attn @ W_o.T, single dense (B*S, H) store.
    wo = wo_ref[...]                                                 # (H, NH*D)
    y = lax.dot_general(attn, wo, (((1,), (1,)), ((), ())),
                        preferred_element_type=jnp.float32)
    o_ref[...] = y.astype(o_ref.dtype)


# ---------------------------- plain-JAX glue ----------------------------
def rope_cos_sin(positions, dim, base):
    # LlamaRotaryEmbedding (no scaling): inv_freq = 1 / base^(2i/d)
    inv_freq = 1.0 / (base ** (jnp.arange(0, dim, 2, dtype=jnp.float32) / dim))
    freqs = positions.astype(jnp.float32)[:, None] * inv_freq[None, :]   # (S, d/2)
    emb = jnp.concatenate([freqs, freqs], axis=-1)                        # (S, d)
    return jnp.cos(emb), jnp.sin(emb)


def causal_mask(batch, seq):
    i = jnp.arange(seq)[:, None]
    j = jnp.arange(seq)[None, :]
    m = jnp.where(j <= i, 0.0, MASK_MIN).astype(jnp.float32)              # (S, S)
    return jnp.broadcast_to(m, (batch, 1, seq, seq))


def llama_attention_forward(hidden_states, params, attention_mask, position_ids):
    # TODO(synk): past_key_value / use_cache / output_attentions and arbitrary (padding /
    # batch-dependent) additive attention_mask not implemented; this is the standard
    # causal-prefill path (mask is generated inside the kernel).
    B, S, H = hidden_states.shape
    x2d = hidden_states.reshape(B * S, H)

    # Concatenated QKV weight -> single projection matmul inside the kernel.
    wqkv = jnp.concatenate([params["wq"], params["wk"], params["wv"]], axis=0)
    qkv_rows = wqkv.shape[0]

    # position_ids identical across batch (arange), so one (S, D) cos/sin table suffices.
    cos, sin = rope_cos_sin(position_ids[0], HEAD_DIM, ROPE_THETA)

    kern = functools.partial(
        fused_llama_attention_kernel,
        batch=B, seq=S, num_heads=NUM_HEADS, num_kv_heads=NUM_KV_HEADS, head_dim=HEAD_DIM)

    out2d = pl.pallas_call(
        kern,
        out_shape=jax.ShapeDtypeStruct((B * S, H), hidden_states.dtype),
        grid=(1,),
        in_specs=[
            pl.BlockSpec((B * S, H), lambda i: (0, 0)),
            pl.BlockSpec((qkv_rows, H), lambda i: (0, 0)),
            pl.BlockSpec((H, NUM_HEADS * HEAD_DIM), lambda i: (0, 0)),
            pl.BlockSpec((S, HEAD_DIM), lambda i: (0, 0)),
            pl.BlockSpec((S, HEAD_DIM), lambda i: (0, 0)),
        ],
        out_specs=pl.BlockSpec((B * S, H), lambda i: (0, 0)),
        compiler_params=pltpu.CompilerParams(dimension_semantics=("arbitrary",)),
    )(x2d, wqkv, params["wo"], cos, sin)

    return out2d.reshape(B, S, H)


def reference_forward(hidden_states, params, attention_mask, position_ids):
    # Pure-JAX reference mirroring HF LlamaAttention math.
    B, S, H = hidden_states.shape
    q = (hidden_states @ params["wq"].T).reshape(B, S, NUM_HEADS, HEAD_DIM).transpose(0, 2, 1, 3)
    k = (hidden_states @ params["wk"].T).reshape(B, S, NUM_KV_HEADS, HEAD_DIM).transpose(0, 2, 1, 3)
    v = (hidden_states @ params["wv"].T).reshape(B, S, NUM_KV_HEADS, HEAD_DIM).transpose(0, 2, 1, 3)
    cos, sin = rope_cos_sin(position_ids[0], HEAD_DIM, ROPE_THETA)

    def rot_half(x):
        hd = HEAD_DIM // 2
        return jnp.concatenate([-x[..., hd:], x[..., :hd]], axis=-1)

    q = q * cos + rot_half(q) * sin
    k = k * cos + rot_half(k) * sin
    k = jnp.repeat(k, KV_GROUPS, axis=1)   # repeat_kv
    v = jnp.repeat(v, KV_GROUPS, axis=1)
    scores = jnp.einsum("bhqd,bhkd->bhqk", q, k) / (HEAD_DIM ** 0.5) + attention_mask
    p = jax.nn.softmax(scores.astype(jnp.float32), axis=-1)
    o = jnp.einsum("bhqk,bhkd->bhqd", p, v)
    o = o.transpose(0, 2, 1, 3).reshape(B, S, H)
    return o @ params["wo"].T


# -------------------------------- main --------------------------------
if __name__ == "__main__":
    key = jax.random.PRNGKey(0)
    kx, kq, kk, kv, ko = jax.random.split(key, 5)

    hidden_states = jax.random.normal(kx, (BATCH, SEQ, HIDDEN), dtype=jnp.float32)
    params = {
        "wq": 0.02 * jax.random.normal(kq, (NUM_HEADS * HEAD_DIM, HIDDEN), dtype=jnp.float32),
        "wk": 0.02 * jax.random.normal(kk, (NUM_KV_HEADS * HEAD_DIM, HIDDEN), dtype=jnp.float32),
        "wv": 0.02 * jax.random.normal(kv, (NUM_KV_HEADS * HEAD_DIM, HIDDEN), dtype=jnp.float32),
        "wo": 0.02 * jax.random.normal(ko, (HIDDEN, NUM_HEADS * HEAD_DIM), dtype=jnp.float32),
    }
    position_ids = jnp.broadcast_to(jnp.arange(SEQ, dtype=jnp.int32)[None, :], (BATCH, SEQ))
    attention_mask = causal_mask(BATCH, SEQ)

    out = llama_attention_forward(hidden_states, params, attention_mask, position_ids)
    out = jax.block_until_ready(out)

    ref = reference_forward(hidden_states, params, attention_mask, position_ids)
    assert out.shape == (BATCH, SEQ, HIDDEN)
    # Tolerance accounts for the EUP approximate reciprocal in the softmax denominator.
    assert jnp.allclose(out, ref, rtol=1e-2, atol=1e-2), "mismatch vs pure-JAX reference"

    print("KERNEL_OK")
</pallas_src>

<mosaic_0001>
module attributes {stable_mosaic.version = 11 : i64} {
  func.func @fused_llama_attention_kernel(%arg0: i32, %arg1: memref<16x32xf32, #tpu.memory_space<vmem>>, %arg2: memref<64x32xf32, #tpu.memory_space<vmem>>, %arg3: memref<32x32xf32, #tpu.memory_space<vmem>>, %arg4: memref<8x8xf32, #tpu.memory_space<vmem>>, %arg5: memref<8x8xf32, #tpu.memory_space<vmem>>, %arg6: memref<16x32xf32, #tpu.memory_space<vmem>>) attributes {dimension_semantics = [#tpu.dimension_semantics<arbitrary>], iteration_bounds = array<i64: 1>, scalar_prefetch = 0 : i64, scratch_operands = 0 : i64, tpu.core_type = #tpu.core_type<tc>, window_params = [{pipeline_mode = #tpu.pipeline_mode<synchronous>, transform_indices = @transform_0, window_bounds = array<i64: 16, 32>}, {pipeline_mode = #tpu.pipeline_mode<synchronous>, transform_indices = @transform_1, window_bounds = array<i64: 64, 32>}, {pipeline_mode = #tpu.pipeline_mode<synchronous>, transform_indices = @transform_2, window_bounds = array<i64: 32, 32>}, {pipeline_mode = #tpu.pipeline_mode<synchronous>, transform_indices = @transform_3, window_bounds = array<i64: 8, 8>}, {pipeline_mode = #tpu.pipeline_mode<synchronous>, transform_indices = @transform_4, window_bounds = array<i64: 8, 8>}, {pipeline_mode = #tpu.pipeline_mode<synchronous>, transform_indices = @transform_5, window_bounds = array<i64: 16, 32>}]} {
    %c0 = arith.constant 0 : index
    %c0_0 = arith.constant 0 : index
    %0 = vector.load %arg1[%c0, %c0_0] : memref<16x32xf32, #tpu.memory_space<vmem>>, vector<16x32xf32>
    %c0_1 = arith.constant 0 : index
    %c0_2 = arith.constant 0 : index
    %1 = vector.load %arg2[%c0_1, %c0_2] : memref<64x32xf32, #tpu.memory_space<vmem>>, vector<64x32xf32>
    %cst = arith.constant dense<0.000000e+00> : vector<16x64xf32>
    %2 = tpu.matmul %0, %1, %cst {dimension_numbers = #tpu.dot_dimension_numbers<[1], [1], [0], [0], [0, 0, 1, 0], [], []>} : vector<16x32xf32>, vector<64x32xf32>, vector<16x64xf32> -> vector<16x64xf32>
    %3 = vector.extract_strided_slice %2 {offsets = [0, 0], sizes = [16, 32], strides = [1, 1]} : vector<16x64xf32> to vector<16x32xf32>
    %4 = vector.extract_strided_slice %2 {offsets = [0, 32], sizes = [16, 16], strides = [1, 1]} : vector<16x64xf32> to vector<16x16xf32>
    %5 = vector.extract_strided_slice %2 {offsets = [0, 48], sizes = [16, 16], strides = [1, 1]} : vector<16x64xf32> to vector<16x16xf32>
    %c0_3 = arith.constant 0 : index
    %c0_4 = arith.constant 0 : index
    %6 = vector.load %arg4[%c0_3, %c0_4] : memref<8x8xf32, #tpu.memory_space<vmem>>, vector<8x8xf32>
    %c0_5 = arith.constant 0 : index
    %c0_6 = arith.constant 0 : index
    %7 = vector.load %arg5[%c0_5, %c0_6] : memref<8x8xf32, #tpu.memory_space<vmem>>, vector<8x8xf32>
    %8 = tpu.iota {dimensions = array<i32: 0>} : vector<8x8xi32>
    %9 = tpu.iota {dimensions = array<i32: 1>} : vector<8x8xi32>
    %10 = arith.cmpi sle, %9, %8 : vector<8x8xi32>
    %11 = vector.extract_strided_slice %3 {offsets = [0, 0], sizes = [8, 32], strides = [1, 1]} : vector<16x32xf32> to vector<8x32xf32>
    %12 = vector.extract_strided_slice %4 {offsets = [0, 0], sizes = [8, 16], strides = [1, 1]} : vector<16x16xf32> to vector<8x16xf32>
    %13 = vector.extract_strided_slice %5 {offsets = [0, 0], sizes = [8, 16], strides = [1, 1]} : vector<16x16xf32> to vector<8x16xf32>
    %14 = vector.extract_strided_slice %12 {offsets = [0, 0], sizes = [8, 8], strides = [1, 1]} : vector<8x16xf32> to vector<8x8xf32>
    %15 = vector.extract_strided_slice %14 {offsets = [0, 4], sizes = [8, 4], strides = [1, 1]} : vector<8x8xf32> to vector<8x4xf32>
    %cst_7 = arith.constant 0.000000e+00 : f32
    %16 = vector.broadcast %cst_7 : f32 to vector<8x4xf32>
    %17 = arith.subf %16, %15 : vector<8x4xf32>
    %18 = vector.extract_strided_slice %14 {offsets = [0, 0], sizes = [8, 4], strides = [1, 1]} : vector<8x8xf32> to vector<8x4xf32>
    %19 = tpu.concatenate %17, %18 in 1 : vector<8x4xf32>, vector<8x4xf32> -> vector<8x8xf32>
    %20 = arith.mulf %14, %6 : vector<8x8xf32>
    %21 = arith.mulf %19, %7 : vector<8x8xf32>
    %22 = arith.addf %20, %21 : vector<8x8xf32>
    %23 = vector.extract_strided_slice %12 {offsets = [0, 8], sizes = [8, 8], strides = [1, 1]} : vector<8x16xf32> to vector<8x8xf32>
    %24 = vector.extract_strided_slice %23 {offsets = [0, 4], sizes = [8, 4], strides = [1, 1]} : vector<8x8xf32> to vector<8x4xf32>
    %cst_8 = arith.constant 0.000000e+00 : f32
    %25 = vector.broadcast %cst_8 : f32 to vector<8x4xf32>
    %26 = arith.subf %25, %24 : vector<8x4xf32>
    %27 = vector.extract_strided_slice %23 {offsets = [0, 0], sizes = [8, 4], strides = [1, 1]} : vector<8x8xf32> to vector<8x4xf32>
    %28 = tpu.concatenate %26, %27 in 1 : vector<8x4xf32>, vector<8x4xf32> -> vector<8x8xf32>
    %29 = arith.mulf %23, %6 : vector<8x8xf32>
    %30 = arith.mulf %28, %7 : vector<8x8xf32>
    %31 = arith.addf %29, %30 : vector<8x8xf32>
    %32 = vector.extract_strided_slice %11 {offsets = [0, 0], sizes = [8, 8], strides = [1, 1]} : vector<8x32xf32> to vector<8x8xf32>
    %33 = vector.extract_strided_slice %32 {offsets = [0, 4], sizes = [8, 4], strides = [1, 1]} : vector<8x8xf32> to vector<8x4xf32>
    %cst_9 = arith.constant 0.000000e+00 : f32
    %34 = vector.broadcast %cst_9 : f32 to vector<8x4xf32>
    %35 = arith.subf %34, %33 : vector<8x4xf32>
    %36 = vector.extract_strided_slice %32 {offsets = [0, 0], sizes = [8, 4], strides = [1, 1]} : vector<8x8xf32> to vector<8x4xf32>
    %37 = tpu.concatenate %35, %36 in 1 : vector<8x4xf32>, vector<8x4xf32> -> vector<8x8xf32>
    %38 = arith.mulf %32, %6 : vector<8x8xf32>
    %39 = arith.mulf %37, %7 : vector<8x8xf32>
    %40 = arith.addf %38, %39 : vector<8x8xf32>
    %41 = vector.extract_strided_slice %13 {offsets = [0, 0], sizes = [8, 8], strides = [1, 1]} : vector<8x16xf32> to vector<8x8xf32>
    %cst_10 = arith.constant dense<0.000000e+00> : vector<8x8xf32>
    %42 = tpu.matmul %40, %22, %cst_10 {dimension_numbers = #tpu.dot_dimension_numbers<[1], [1], [0], [0], [0, 0, 1, 0], [], []>} : vector<8x8xf32>, vector<8x8xf32>, vector<8x8xf32> -> vector<8x8xf32>
    %cst_11 = arith.constant 0.353553385 : f32
    %43 = vector.broadcast %cst_11 : f32 to vector<8x8xf32>
    %44 = arith.mulf %42, %43 : vector<8x8xf32>
    %cst_12 = arith.constant -1.000000e+09 : f32
    %45 = vector.broadcast %cst_12 : f32 to vector<8x8xf32>
    %46 = arith.select %10, %44, %45 : vector<8x8xi1>, vector<8x8xf32>
    %cst_13 = arith.constant dense<0xFF800000> : vector<8xf32>
    %47 = vector.multi_reduction <maximumf>, %46, %cst_13 [1] : vector<8x8xf32> to vector<8xf32>
    %48 = vector.shape_cast %47 : vector<8xf32> to vector<8x1xf32>
    %49 = vector.broadcast %48 : vector<8x1xf32> to vector<8x8xf32>
    %50 = arith.subf %46, %49 : vector<8x8xf32>
    %51 = math.exp %50 : vector<8x8xf32>
    %cst_14 = arith.constant dense<0.000000e+00> : vector<8xf32>
    %52 = vector.multi_reduction <add>, %51, %cst_14 [1] : vector<8x8xf32> to vector<8xf32>
    %53 = vector.shape_cast %52 : vector<8xf32> to vector<8x1xf32>
    %54 = tpu.reciprocal %53 {approx = true} : vector<8x1xf32> -> vector<8x1xf32>
    %55 = vector.broadcast %54 : vector<8x1xf32> to vector<8x8xf32>
    %56 = arith.mulf %51, %55 : vector<8x8xf32>
    %cst_15 = arith.constant dense<0.000000e+00> : vector<8x8xf32>
    %57 = tpu.matmul %56, %41, %cst_15 {dimension_numbers = #tpu.dot_dimension_numbers<[1], [0], [0], [1], [0, 0, 1, 1], [], []>} : vector<8x8xf32>, vector<8x8xf32>, vector<8x8xf32> -> vector<8x8xf32>
    %58 = vector.extract_strided_slice %11 {offsets = [0, 8], sizes = [8, 8], strides = [1, 1]} : vector<8x32xf32> to vector<8x8xf32>
    %59 = vector.extract_strided_slice %58 {offsets = [0, 4], sizes = [8, 4], strides = [1, 1]} : vector<8x8xf32> to vector<8x4xf32>
    %cst_16 = arith.constant 0.000000e+00 : f32
    %60 = vector.broadcast %cst_16 : f32 to vector<8x4xf32>
    %61 = arith.subf %60, %59 : vector<8x4xf32>
    %62 = vector.extract_strided_slice %58 {offsets = [0, 0], sizes = [8, 4], strides = [1, 1]} : vector<8x8xf32> to vector<8x4xf32>
    %63 = tpu.concatenate %61, %62 in 1 : vector<8x4xf32>, vector<8x4xf32> -> vector<8x8xf32>
    %64 = arith.mulf %58, %6 : vector<8x8xf32>
    %65 = arith.mulf %63, %7 : vector<8x8xf32>
    %66 = arith.addf %64, %65 : vector<8x8xf32>
    %67 = vector.extract_strided_slice %13 {offsets = [0, 0], sizes = [8, 8], strides = [1, 1]} : vector<8x16xf32> to vector<8x8xf32>
    %cst_17 = arith.constant dense<0.000000e+00> : vector<8x8xf32>
    %68 = tpu.matmul %66, %22, %cst_17 {dimension_numbers = #tpu.dot_dimension_numbers<[1], [1], [0], [0], [0, 0, 1, 0], [], []>} : vector<8x8xf32>, vector<8x8xf32>, vector<8x8xf32> -> vector<8x8xf32>
    %cst_18 = arith.constant 0.353553385 : f32
    %69 = vector.broadcast %cst_18 : f32 to vector<8x8xf32>
    %70 = arith.mulf %68, %69 : vector<8x8xf32>
    %cst_19 = arith.constant -1.000000e+09 : f32
    %71 = vector.broadcast %cst_19 : f32 to vector<8x8xf32>
    %72 = arith.select %10, %70, %71 : vector<8x8xi1>, vector<8x8xf32>
    %cst_20 = arith.constant dense<0xFF800000> : vector<8xf32>
    %73 = vector.multi_reduction <maximumf>, %72, %cst_20 [1] : vector<8x8xf32> to vector<8xf32>
    %74 = vector.shape_cast %73 : vector<8xf32> to vector<8x1xf32>
    %75 = vector.broadcast %74 : vector<8x1xf32> to vector<8x8xf32>
    %76 = arith.subf %72, %75 : vector<8x8xf32>
    %77 = math.exp %76 : vector<8x8xf32>
    %cst_21 = arith.constant dense<0.000000e+00> : vector<8xf32>
    %78 = vector.multi_reduction <add>, %77, %cst_21 [1] : vector<8x8xf32> to vector<8xf32>
    %79 = vector.shape_cast %78 : vector<8xf32> to vector<8x1xf32>
    %80 = tpu.reciprocal %79 {approx = true} : vector<8x1xf32> -> vector<8x1xf32>
    %81 = vector.broadcast %80 : vector<8x1xf32> to vector<8x8xf32>
    %82 = arith.mulf %77, %81 : vector<8x8xf32>
    %cst_22 = arith.constant dense<0.000000e+00> : vector<8x8xf32>
    %83 = tpu.matmul %82, %67, %cst_22 {dimension_numbers = #tpu.dot_dimension_numbers<[1], [0], [0], [1], [0, 0, 1, 1], [], []>} : vector<8x8xf32>, vector<8x8xf32>, vector<8x8xf32> -> vector<8x8xf32>
    %84 = vector.extract_strided_slice %11 {offsets = [0, 16], sizes = [8, 8], strides = [1, 1]} : vector<8x32xf32> to vector<8x8xf32>
    %85 = vector.extract_strided_slice %84 {offsets = [0, 4], sizes = [8, 4], strides = [1, 1]} : vector<8x8xf32> to vector<8x4xf32>
    %cst_23 = arith.constant 0.000000e+00 : f32
    %86 = vector.broadcast %cst_23 : f32 to vector<8x4xf32>
    %87 = arith.subf %86, %85 : vector<8x4xf32>
    %88 = vector.extract_strided_slice %84 {offsets = [0, 0], sizes = [8, 4], strides = [1, 1]} : vector<8x8xf32> to vector<8x4xf32>
    %89 = tpu.concatenate %87, %88 in 1 : vector<8x4xf32>, vector<8x4xf32> -> vector<8x8xf32>
    %90 = arith.mulf %84, %6 : vector<8x8xf32>
    %91 = arith.mulf %89, %7 : vector<8x8xf32>
    %92 = arith.addf %90, %91 : vector<8x8xf32>
    %93 = vector.extract_strided_slice %13 {offsets = [0, 8], sizes = [8, 8], strides = [1, 1]} : vector<8x16xf32> to vector<8x8xf32>
    %cst_24 = arith.constant dense<0.000000e+00> : vector<8x8xf32>
    %94 = tpu.matmul %92, %31, %cst_24 {dimension_numbers = #tpu.dot_dimension_numbers<[1], [1], [0], [0], [0, 0, 1, 0], [], []>} : vector<8x8xf32>, vector<8x8xf32>, vector<8x8xf32> -> vector<8x8xf32>
    %cst_25 = arith.constant 0.353553385 : f32
    %95 = vector.broadcast %cst_25 : f32 to vector<8x8xf32>
    %96 = arith.mulf %94, %95 : vector<8x8xf32>
    %cst_26 = arith.constant -1.000000e+09 : f32
    %97 = vector.broadcast %cst_26 : f32 to vector<8x8xf32>
    %98 = arith.select %10, %96, %97 : vector<8x8xi1>, vector<8x8xf32>
    %cst_27 = arith.constant dense<0xFF800000> : vector<8xf32>
    %99 = vector.multi_reduction <maximumf>, %98, %cst_27 [1] : vector<8x8xf32> to vector<8xf32>
    %100 = vector.shape_cast %99 : vector<8xf32> to vector<8x1xf32>
    %101 = vector.broadcast %100 : vector<8x1xf32> to vector<8x8xf32>
    %102 = arith.subf %98, %101 : vector<8x8xf32>
    %103 = math.exp %102 : vector<8x8xf32>
    %cst_28 = arith.constant dense<0.000000e+00> : vector<8xf32>
    %104 = vector.multi_reduction <add>, %103, %cst_28 [1] : vector<8x8xf32> to vector<8xf32>
    %105 = vector.shape_cast %104 : vector<8xf32> to vector<8x1xf32>
    %106 = tpu.reciprocal %105 {approx = true} : vector<8x1xf32> -> vector<8x1xf32>
    %107 = vector.broadcast %106 : vector<8x1xf32> to vector<8x8xf32>
    %108 = arith.mulf %103, %107 : vector<8x8xf32>
    %cst_29 = arith.constant dense<0.000000e+00> : vector<8x8xf32>
    %109 = tpu.matmul %108, %93, %cst_29 {dimension_numbers = #tpu.dot_dimension_numbers<[1], [0], [0], [1], [0, 0, 1, 1], [], []>} : vector<8x8xf32>, vector<8x8xf32>, vector<8x8xf32> -> vector<8x8xf32>
    %110 = vector.extract_strided_slice %11 {offsets = [0, 24], sizes = [8, 8], strides = [1, 1]} : vector<8x32xf32> to vector<8x8xf32>
    %111 = vector.extract_strided_slice %110 {offsets = [0, 4], sizes = [8, 4], strides = [1, 1]} : vector<8x8xf32> to vector<8x4xf32>
    %cst_30 = arith.constant 0.000000e+00 : f32
    %112 = vector.broadcast %cst_30 : f32 to vector<8x4xf32>
    %113 = arith.subf %112, %111 : vector<8x4xf32>
    %114 = vector.extract_strided_slice %110 {offsets = [0, 0], sizes = [8, 4], strides = [1, 1]} : vector<8x8xf32> to vector<8x4xf32>
    %115 = tpu.concatenate %113, %114 in 1 : vector<8x4xf32>, vector<8x4xf32> -> vector<8x8xf32>
    %116 = arith.mulf %110, %6 : vector<8x8xf32>
    %117 = arith.mulf %115, %7 : vector<8x8xf32>
    %118 = arith.addf %116, %117 : vector<8x8xf32>
    %119 = vector.extract_strided_slice %13 {offsets = [0, 8], sizes = [8, 8], strides = [1, 1]} : vector<8x16xf32> to vector<8x8xf32>
    %cst_31 = arith.constant dense<0.000000e+00> : vector<8x8xf32>
    %120 = tpu.matmul %118, %31, %cst_31 {dimension_numbers = #tpu.dot_dimension_numbers<[1], [1], [0], [0], [0, 0, 1, 0], [], []>} : vector<8x8xf32>, vector<8x8xf32>, vector<8x8xf32> -> vector<8x8xf32>
    %cst_32 = arith.constant 0.353553385 : f32
    %121 = vector.broadcast %cst_32 : f32 to vector<8x8xf32>
    %122 = arith.mulf %120, %121 : vector<8x8xf32>
    %cst_33 = arith.constant -1.000000e+09 : f32
    %123 = vector.broadcast %cst_33 : f32 to vector<8x8xf32>
    %124 = arith.select %10, %122, %123 : vector<8x8xi1>, vector<8x8xf32>
    %cst_34 = arith.constant dense<0xFF800000> : vector<8xf32>
    %125 = vector.multi_reduction <maximumf>, %124, %cst_34 [1] : vector<8x8xf32> to vector<8xf32>
    %126 = vector.shape_cast %125 : vector<8xf32> to vector<8x1xf32>
    %127 = vector.broadcast %126 : vector<8x1xf32> to vector<8x8xf32>
    %128 = arith.subf %124, %127 : vector<8x8xf32>
    %129 = math.exp %128 : vector<8x8xf32>
    %cst_35 = arith.constant dense<0.000000e+00> : vector<8xf32>
    %130 = vector.multi_reduction <add>, %129, %cst_35 [1] : vector<8x8xf32> to vector<8xf32>
    %131 = vector.shape_cast %130 : vector<8xf32> to vector<8x1xf32>
    %132 = tpu.reciprocal %131 {approx = true} : vector<8x1xf32> -> vector<8x1xf32>
    %133 = vector.broadcast %132 : vector<8x1xf32> to vector<8x8xf32>
    %134 = arith.mulf %129, %133 : vector<8x8xf32>
    %cst_36 = arith.constant dense<0.000000e+00> : vector<8x8xf32>
    %135 = tpu.matmul %134, %119, %cst_36 {dimension_numbers = #tpu.dot_dimension_numbers<[1], [0], [0], [1], [0, 0, 1, 1], [], []>} : vector<8x8xf32>, vector<8x8xf32>, vector<8x8xf32> -> vector<8x8xf32>
    %136 = tpu.concatenate %57, %83, %109, %135 in 1 : vector<8x8xf32>, vector<8x8xf32>, vector<8x8xf32>, vector<8x8xf32> -> vector<8x32xf32>
    %137 = vector.extract_strided_slice %3 {offsets = [8, 0], sizes = [8, 32], strides = [1, 1]} : vector<16x32xf32> to vector<8x32xf32>
    %138 = vector.extract_strided_slice %4 {offsets = [8, 0], sizes = [8, 16], strides = [1, 1]} : vector<16x16xf32> to vector<8x16xf32>
    %139 = vector.extract_strided_slice %5 {offsets = [8, 0], sizes = [8, 16], strides = [1, 1]} : vector<16x16xf32> to vector<8x16xf32>
    %140 = vector.extract_strided_slice %138 {offsets = [0, 0], sizes = [8, 8], strides = [1, 1]} : vector<8x16xf32> to vector<8x8xf32>
    %141 = vector.extract_strided_slice %140 {offsets = [0, 4], sizes = [8, 4], strides = [1, 1]} : vector<8x8xf32> to vector<8x4xf32>
    %cst_37 = arith.constant 0.000000e+00 : f32
    %142 = vector.broadcast %cst_37 : f32 to vector<8x4xf32>
    %143 = arith.subf %142, %141 : vector<8x4xf32>
    %144 = vector.extract_strided_slice %140 {offsets = [0, 0], sizes = [8, 4], strides = [1, 1]} : vector<8x8xf32> to vector<8x4xf32>
    %145 = tpu.concatenate %143, %144 in 1 : vector<8x4xf32>, vector<8x4xf32> -> vector<8x8xf32>
    %146 = arith.mulf %140, %6 : vector<8x8xf32>
    %147 = arith.mulf %145, %7 : vector<8x8xf32>
    %148 = arith.addf %146, %147 : vector<8x8xf32>
    %149 = vector.extract_strided_slice %138 {offsets = [0, 8], sizes = [8, 8], strides = [1, 1]} : vector<8x16xf32> to vector<8x8xf32>
    %150 = vector.extract_strided_slice %149 {offsets = [0, 4], sizes = [8, 4], strides = [1, 1]} : vector<8x8xf32> to vector<8x4xf32>
    %cst_38 = arith.constant 0.000000e+00 : f32
    %151 = vector.broadcast %cst_38 : f32 to vector<8x4xf32>
    %152 = arith.subf %151, %150 : vector<8x4xf32>
    %153 = vector.extract_strided_slice %149 {offsets = [0, 0], sizes = [8, 4], strides = [1, 1]} : vector<8x8xf32> to vector<8x4xf32>
    %154 = tpu.concatenate %152, %153 in 1 : vector<8x4xf32>, vector<8x4xf32> -> vector<8x8xf32>
    %155 = arith.mulf %149, %6 : vector<8x8xf32>
    %156 = arith.mulf %154, %7 : vector<8x8xf32>
    %157 = arith.addf %155, %156 : vector<8x8xf32>
    %158 = vector.extract_strided_slice %137 {offsets = [0, 0], sizes = [8, 8], strides = [1, 1]} : vector<8x32xf32> to vector<8x8xf32>
    %159 = vector.extract_strided_slice %158 {offsets = [0, 4], sizes = [8, 4], strides = [1, 1]} : vector<8x8xf32> to vector<8x4xf32>
    %cst_39 = arith.constant 0.000000e+00 : f32
    %160 = vector.broadcast %cst_39 : f32 to vector<8x4xf32>
    %161 = arith.subf %160, %159 : vector<8x4xf32>
    %162 = vector.extract_strided_slice %158 {offsets = [0, 0], sizes = [8, 4], strides = [1, 1]} : vector<8x8xf32> to vector<8x4xf32>
    %163 = tpu.concatenate %161, %162 in 1 : vector<8x4xf32>, vector<8x4xf32> -> vector<8x8xf32>
    %164 = arith.mulf %158, %6 : vector<8x8xf32>
    %165 = arith.mulf %163, %7 : vector<8x8xf32>
    %166 = arith.addf %164, %165 : vector<8x8xf32>
    %167 = vector.extract_strided_slice %139 {offsets = [0, 0], sizes = [8, 8], strides = [1, 1]} : vector<8x16xf32> to vector<8x8xf32>
    %cst_40 = arith.constant dense<0.000000e+00> : vector<8x8xf32>
    %168 = tpu.matmul %166, %148, %cst_40 {dimension_numbers = #tpu.dot_dimension_numbers<[1], [1], [0], [0], [0, 0, 1, 0], [], []>} : vector<8x8xf32>, vector<8x8xf32>, vector<8x8xf32> -> vector<8x8xf32>
    %cst_41 = arith.constant 0.353553385 : f32
    %169 = vector.broadcast %cst_41 : f32 to vector<8x8xf32>
    %170 = arith.mulf %168, %169 : vector<8x8xf32>
    %cst_42 = arith.constant -1.000000e+09 : f32
    %171 = vector.broadcast %cst_42 : f32 to vector<8x8xf32>
    %172 = arith.select %10, %170, %171 : vector<8x8xi1>, vector<8x8xf32>
    %cst_43 = arith.constant dense<0xFF800000> : vector<8xf32>
    %173 = vector.multi_reduction <maximumf>, %172, %cst_43 [1] : vector<8x8xf32> to vector<8xf32>
    %174 = vector.shape_cast %173 : vector<8xf32> to vector<8x1xf32>
    %175 = vector.broadcast %174 : vector<8x1xf32> to vector<8x8xf32>
    %176 = arith.subf %172, %175 : vector<8x8xf32>
    %177 = math.exp %176 : vector<8x8xf32>
    %cst_44 = arith.constant dense<0.000000e+00> : vector<8xf32>
    %178 = vector.multi_reduction <add>, %177, %cst_44 [1] : vector<8x8xf32> to vector<8xf32>
    %179 = vector.shape_cast %178 : vector<8xf32> to vector<8x1xf32>
    %180 = tpu.reciprocal %179 {approx = true} : vector<8x1xf32> -> vector<8x1xf32>
    %181 = vector.broadcast %180 : vector<8x1xf32> to vector<8x8xf32>
    %182 = arith.mulf %177, %181 : vector<8x8xf32>
    %cst_45 = arith.constant dense<0.000000e+00> : vector<8x8xf32>
    %183 = tpu.matmul %182, %167, %cst_45 {dimension_numbers = #tpu.dot_dimension_numbers<[1], [0], [0], [1], [0, 0, 1, 1], [], []>} : vector<8x8xf32>, vector<8x8xf32>, vector<8x8xf32> -> vector<8x8xf32>
    %184 = vector.extract_strided_slice %137 {offsets = [0, 8], sizes = [8, 8], strides = [1, 1]} : vector<8x32xf32> to vector<8x8xf32>
    %185 = vector.extract_strided_slice %184 {offsets = [0, 4], sizes = [8, 4], strides = [1, 1]} : vector<8x8xf32> to vector<8x4xf32>
    %cst_46 = arith.constant 0.000000e+00 : f32
    %186 = vector.broadcast %cst_46 : f32 to vector<8x4xf32>
    %187 = arith.subf %186, %185 : vector<8x4xf32>
    %188 = vector.extract_strided_slice %184 {offsets = [0, 0], sizes = [8, 4], strides = [1, 1]} : vector<8x8xf32> to vector<8x4xf32>
    %189 = tpu.concatenate %187, %188 in 1 : vector<8x4xf32>, vector<8x4xf32> -> vector<8x8xf32>
    %190 = arith.mulf %184, %6 : vector<8x8xf32>
    %191 = arith.mulf %189, %7 : vector<8x8xf32>
    %192 = arith.addf %190, %191 : vector<8x8xf32>
    %193 = vector.extract_strided_slice %139 {offsets = [0, 0], sizes = [8, 8], strides = [1, 1]} : vector<8x16xf32> to vector<8x8xf32>
    %cst_47 = arith.constant dense<0.000000e+00> : vector<8x8xf32>
    %194 = tpu.matmul %192, %148, %cst_47 {dimension_numbers = #tpu.dot_dimension_numbers<[1], [1], [0], [0], [0, 0, 1, 0], [], []>} : vector<8x8xf32>, vector<8x8xf32>, vector<8x8xf32> -> vector<8x8xf32>
    %cst_48 = arith.constant 0.353553385 : f32
    %195 = vector.broadcast %cst_48 : f32 to vector<8x8xf32>
    %196 = arith.mulf %194, %195 : vector<8x8xf32>
    %cst_49 = arith.constant -1.000000e+09 : f32
    %197 = vector.broadcast %cst_49 : f32 to vector<8x8xf32>
    %198 = arith.select %10, %196, %197 : vector<8x8xi1>, vector<8x8xf32>
    %cst_50 = arith.constant dense<0xFF800000> : vector<8xf32>
    %199 = vector.multi_reduction <maximumf>, %198, %cst_50 [1] : vector<8x8xf32> to vector<8xf32>
    %200 = vector.shape_cast %199 : vector<8xf32> to vector<8x1xf32>
    %201 = vector.broadcast %200 : vector<8x1xf32> to vector<8x8xf32>
    %202 = arith.subf %198, %201 : vector<8x8xf32>
    %203 = math.exp %202 : vector<8x8xf32>
    %cst_51 = arith.constant dense<0.000000e+00> : vector<8xf32>
    %204 = vector.multi_reduction <add>, %203, %cst_51 [1] : vector<8x8xf32> to vector<8xf32>
    %205 = vector.shape_cast %204 : vector<8xf32> to vector<8x1xf32>
    %206 = tpu.reciprocal %205 {approx = true} : vector<8x1xf32> -> vector<8x1xf32>
    %207 = vector.broadcast %206 : vector<8x1xf32> to vector<8x8xf32>
    %208 = arith.mulf %203, %207 : vector<8x8xf32>
    %cst_52 = arith.constant dense<0.000000e+00> : vector<8x8xf32>
    %209 = tpu.matmul %208, %193, %cst_52 {dimension_numbers = #tpu.dot_dimension_numbers<[1], [0], [0], [1], [0, 0, 1, 1], [], []>} : vector<8x8xf32>, vector<8x8xf32>, vector<8x8xf32> -> vector<8x8xf32>
    %210 = vector.extract_strided_slice %137 {offsets = [0, 16], sizes = [8, 8], strides = [1, 1]} : vector<8x32xf32> to vector<8x8xf32>
    %211 = vector.extract_strided_slice %210 {offsets = [0, 4], sizes = [8, 4], strides = [1, 1]} : vector<8x8xf32> to vector<8x4xf32>
    %cst_53 = arith.constant 0.000000e+00 : f32
    %212 = vector.broadcast %cst_53 : f32 to vector<8x4xf32>
    %213 = arith.subf %212, %211 : vector<8x4xf32>
    %214 = vector.extract_strided_slice %210 {offsets = [0, 0], sizes = [8, 4], strides = [1, 1]} : vector<8x8xf32> to vector<8x4xf32>
    %215 = tpu.concatenate %213, %214 in 1 : vector<8x4xf32>, vector<8x4xf32> -> vector<8x8xf32>
    %216 = arith.mulf %210, %6 : vector<8x8xf32>
    %217 = arith.mulf %215, %7 : vector<8x8xf32>
    %218 = arith.addf %216, %217 : vector<8x8xf32>
    %219 = vector.extract_strided_slice %139 {offsets = [0, 8], sizes = [8, 8], strides = [1, 1]} : vector<8x16xf32> to vector<8x8xf32>
    %cst_54 = arith.constant dense<0.000000e+00> : vector<8x8xf32>
    %220 = tpu.matmul %218, %157, %cst_54 {dimension_numbers = #tpu.dot_dimension_numbers<[1], [1], [0], [0], [0, 0, 1, 0], [], []>} : vector<8x8xf32>, vector<8x8xf32>, vector<8x8xf32> -> vector<8x8xf32>
    %cst_55 = arith.constant 0.353553385 : f32
    %221 = vector.broadcast %cst_55 : f32 to vector<8x8xf32>
    %222 = arith.mulf %220, %221 : vector<8x8xf32>
    %cst_56 = arith.constant -1.000000e+09 : f32
    %223 = vector.broadcast %cst_56 : f32 to vector<8x8xf32>
    %224 = arith.select %10, %222, %223 : vector<8x8xi1>, vector<8x8xf32>
    %cst_57 = arith.constant dense<0xFF800000> : vector<8xf32>
    %225 = vector.multi_reduction <maximumf>, %224, %cst_57 [1] : vector<8x8xf32> to vector<8xf32>
    %226 = vector.shape_cast %225 : vector<8xf32> to vector<8x1xf32>
    %227 = vector.broadcast %226 : vector<8x1xf32> to vector<8x8xf32>
    %228 = arith.subf %224, %227 : vector<8x8xf32>
    %229 = math.exp %228 : vector<8x8xf32>
    %cst_58 = arith.constant dense<0.000000e+00> : vector<8xf32>
    %230 = vector.multi_reduction <add>, %229, %cst_58 [1] : vector<8x8xf32> to vector<8xf32>
    %231 = vector.shape_cast %230 : vector<8xf32> to vector<8x1xf32>
    %232 = tpu.reciprocal %231 {approx = true} : vector<8x1xf32> -> vector<8x1xf32>
    %233 = vector.broadcast %232 : vector<8x1xf32> to vector<8x8xf32>
    %234 = arith.mulf %229, %233 : vector<8x8xf32>
    %cst_59 = arith.constant dense<0.000000e+00> : vector<8x8xf32>
    %235 = tpu.matmul %234, %219, %cst_59 {dimension_numbers = #tpu.dot_dimension_numbers<[1], [0], [0], [1], [0, 0, 1, 1], [], []>} : vector<8x8xf32>, vector<8x8xf32>, vector<8x8xf32> -> vector<8x8xf32>
    %236 = vector.extract_strided_slice %137 {offsets = [0, 24], sizes = [8, 8], strides = [1, 1]} : vector<8x32xf32> to vector<8x8xf32>
    %237 = vector.extract_strided_slice %236 {offsets = [0, 4], sizes = [8, 4], strides = [1, 1]} : vector<8x8xf32> to vector<8x4xf32>
    %cst_60 = arith.constant 0.000000e+00 : f32
    %238 = vector.broadcast %cst_60 : f32 to vector<8x4xf32>
    %239 = arith.subf %238, %237 : vector<8x4xf32>
    %240 = vector.extract_strided_slice %236 {offsets = [0, 0], sizes = [8, 4], strides = [1, 1]} : vector<8x8xf32> to vector<8x4xf32>
    %241 = tpu.concatenate %239, %240 in 1 : vector<8x4xf32>, vector<8x4xf32> -> vector<8x8xf32>
    %242 = arith.mulf %236, %6 : vector<8x8xf32>
    %243 = arith.mulf %241, %7 : vector<8x8xf32>
    %244 = arith.addf %242, %243 : vector<8x8xf32>
    %245 = vector.extract_strided_slice %139 {offsets = [0, 8], sizes = [8, 8], strides = [1, 1]} : vector<8x16xf32> to vector<8x8xf32>
    %cst_61 = arith.constant dense<0.000000e+00> : vector<8x8xf32>
    %246 = tpu.matmul %244, %157, %cst_61 {dimension_numbers = #tpu.dot_dimension_numbers<[1], [1], [0], [0], [0, 0, 1, 0], [], []>} : vector<8x8xf32>, vector<8x8xf32>, vector<8x8xf32> -> vector<8x8xf32>
    %cst_62 = arith.constant 0.353553385 : f32
    %247 = vector.broadcast %cst_62 : f32 to vector<8x8xf32>
    %248 = arith.mulf %246, %247 : vector<8x8xf32>
    %cst_63 = arith.constant -1.000000e+09 : f32
    %249 = vector.broadcast %cst_63 : f32 to vector<8x8xf32>
    %250 = arith.select %10, %248, %249 : vector<8x8xi1>, vector<8x8xf32>
    %cst_64 = arith.constant dense<0xFF800000> : vector<8xf32>
    %251 = vector.multi_reduction <maximumf>, %250, %cst_64 [1] : vector<8x8xf32> to vector<8xf32>
    %252 = vector.shape_cast %251 : vector<8xf32> to vector<8x1xf32>
    %253 = vector.broadcast %252 : vector<8x1xf32> to vector<8x8xf32>
    %254 = arith.subf %250, %253 : vector<8x8xf32>
    %255 = math.exp %254 : vector<8x8xf32>
    %cst_65 = arith.constant dense<0.000000e+00> : vector<8xf32>
    %256 = vector.multi_reduction <add>, %255, %cst_65 [1] : vector<8x8xf32> to vector<8xf32>
    %257 = vector.shape_cast %256 : vector<8xf32> to vector<8x1xf32>
    %258 = tpu.reciprocal %257 {approx = true} : vector<8x1xf32> -> vector<8x1xf32>
    %259 = vector.broadcast %258 : vector<8x1xf32> to vector<8x8xf32>
    %260 = arith.mulf %255, %259 : vector<8x8xf32>
    %cst_66 = arith.constant dense<0.000000e+00> : vector<8x8xf32>
    %261 = tpu.matmul %260, %245, %cst_66 {dimension_numbers = #tpu.dot_dimension_numbers<[1], [0], [0], [1], [0, 0, 1, 1], [], []>} : vector<8x8xf32>, vector<8x8xf32>, vector<8x8xf32> -> vector<8x8xf32>
    %262 = tpu.concatenate %183, %209, %235, %261 in 1 : vector<8x8xf32>, vector<8x8xf32>, vector<8x8xf32>, vector<8x8xf32> -> vector<8x32xf32>
    %263 = tpu.concatenate %136, %262 in 0 : vector<8x32xf32>, vector<8x32xf32> -> vector<16x32xf32>
    %c0_67 = arith.constant 0 : index
    %c0_68 = arith.constant 0 : index
    %264 = vector.load %arg3[%c0_67, %c0_68] : memref<32x32xf32, #tpu.memory_space<vmem>>, vector<32x32xf32>
    %cst_69 = arith.constant dense<0.000000e+00> : vector<16x32xf32>
    %265 = tpu.matmul %263, %264, %cst_69 {dimension_numbers = #tpu.dot_dimension_numbers<[1], [1], [0], [0], [0, 0, 1, 0], [], []>} : vector<16x32xf32>, vector<32x32xf32>, vector<16x32xf32> -> vector<16x32xf32>
    %c0_70 = arith.constant 0 : index
    %c0_71 = arith.constant 0 : index
    %266 = vector.load %arg6[%c0_70, %c0_71] : memref<16x32xf32, #tpu.memory_space<vmem>>, vector<16x32xf32>
    tpu.vector_store %arg6[%c0_70, %c0_71], %265 {strides = array<i32>} : memref<16x32xf32, #tpu.memory_space<vmem>>, vector<16x32xf32>,
    return
  }
  func.func @transform_0(%arg0: i32) -> (i32, i32) {
    %c0_i32 = arith.constant 0 : i32
    %c0_i32_0 = arith.constant 0 : i32
    %c0_i32_1 = arith.constant 0 : i32
    return %c0_i32, %c0_i32_0 : i32, i32
  }
  func.func @transform_1(%arg0: i32) -> (i32, i32) {
    %c0_i32 = arith.constant 0 : i32
    %c0_i32_0 = arith.constant 0 : i32
    %c0_i32_1 = arith.constant 0 : i32
    return %c0_i32, %c0_i32_0 : i32, i32
  }
  func.func @transform_2(%arg0: i32) -> (i32, i32) {
    %c0_i32 = arith.constant 0 : i32
    %c0_i32_0 = arith.constant 0 : i32
    %c0_i32_1 = arith.constant 0 : i32
    return %c0_i32, %c0_i32_0 : i32, i32
  }
  func.func @transform_3(%arg0: i32) -> (i32, i32) {
    %c0_i32 = arith.constant 0 : i32
    %c0_i32_0 = arith.constant 0 : i32
    %c0_i32_1 = arith.constant 0 : i32
    return %c0_i32, %c0_i32_0 : i32, i32
  }
  func.func @transform_4(%arg0: i32) -> (i32, i32) {
    %c0_i32 = arith.constant 0 : i32
    %c0_i32_0 = arith.constant 0 : i32
    %c0_i32_1 = arith.constant 0 : i32
    return %c0_i32, %c0_i32_0 : i32, i32
  }
  func.func @transform_5(%arg0: i32) -> (i32, i32) {
    %c0_i32 = arith.constant 0 : i32
    %c0_i32_0 = arith.constant 0 : i32
    %c0_i32_1 = arith.constant 0 : i32
    return %c0_i32, %c0_i32_0 : i32, i32
  }
}

</mosaic_0001>

<bundles_post_ra>
// kernel: tpu_custom_call.1
= control target key start
LH: loop header
LB: loop body
LE: loop exit
PB: predicated region body
PF: predicated region fallthrough
CT: control target
= control target key end

     0   :  { %vm31_vm0 = vcmask 261120   ;;  %s2557_s0 = inlined_call_operand.vmem [shape: f32[16,32], index: 0, kind: input, shape index: {}]   ;;  %s2558_s1 = inlined_call_operand.vmem [shape: f32[64,32], index: 1, kind: input, shape index: {}]   ;;  %s2559_s2 = inlined_call_operand.vmem [shape: f32[32,32], index: 2, kind: input, shape index: {}]   ;;  %s2560_s3 = inlined_call_operand.vmem [shape: f32[8,8], index: 3, kind: input, shape index: {}]   ;;  %s2561_s4 = inlined_call_operand.vmem [shape: f32[8,8], index: 4, kind: input, shape index: {}]   ;;  %s2562_s5 = inlined_call_operand.hbm [shape: f32[16,32], index: 5, kind: output, shape index: {}]  }
   0x1   :  { %v23_v0 = vld [vmem:[%s2558_s1] sm:$0xff]  ;;  %v24_v1 = vld [vmem:[%s2558_s1 + $0x8] sm:$0xff]  ;;  %v25_v2 = vld [vmem:[%s2558_s1 + $0x10] sm:$0xff] }
   0x2   :  { %v1989_v3 = vpack.c.bf16 %v24_v1, %v23_v0  ;;  %vm2168_vm1 = vmpackc.low %vm31_vm0, %vm31_vm0  ;;  %v26_v5 = vld [vmem:[%s2558_s1 + $0x18] sm:$0xff]  ;;  %v21_v7 = vld [vmem:[%s2557_s0] sm:$0xff] }
   0x3   :  { %v1995_v6 = vpack.c.bf16 %v26_v5, %v25_v2  ;;  %v2183_v8 = vld [vmem:[%s2560_s3] sm:$0xff]  ;;  %1895 = vmatprep.mubr.msk.f32.mxu0 %vm31_vm0, %v21_v7 }
   0x4   :  { %1991 = vmatprep.subr.msk.bf16.mxu0 %vm2168_vm1, %v1989_v3 }
   0x5   :  { %1994 = vmatpush3.bf16.xpose.msk.msra.mxu0 %vm2168_vm1, %v1989_v3 }
   0x6   :  { %10 = vsyncpa [#allocation3], 0  ;;  %1997 = vmatprep.subr.msk.bf16.mxu0 %vm2168_vm1, %v1995_v6  ;;  %s2104_s30 = smov 32   ;;  %v27_v9 = vld [vmem:[%s2558_s1 + $0x20] sm:$0xff]  ;;  %v28_v10 = vld [vmem:[%s2558_s1 + $0x28] sm:$0xff]  ;;  %s2106_s15 = smov 100   ;;  %v139_v40 = vlaneseq }
   0x7   :  { %156 = vrot.lane.b32.xlu1 %v2183_v8, %s2104_s30  ;;  %v2001_v11 = vpack.c.bf16 %v28_v10, %v27_v9  ;;  %v29_v12 = vld [vmem:[%s2558_s1 + $0x30] sm:$0xff]  ;;  %v30_v13 = vld [vmem:[%s2558_s1 + $0x38] sm:$0xff]  ;;  %v22_v15 = vld [vmem:[%s2557_s0 + $0x8] sm:$0xff]  ;;  %s2105_s1 = smov 92   ;;  %s2107_s16 = smov 124   ;;  %vm153_vm2 = vcmask 31744  }
   0x8   :  { %v2007_v14 = vpack.c.bf16 %v30_v13, %v29_v12  ;;  %v2234_v20 = vld [vmem:[%s2561_s4] sm:$0xff]  ;;  %v2108_v24 = vmov 0.0   ;;  %s2109_s18 = smov 4   ;;  %s2110_s19 = smov 116   ;;  %vm2111_vm3 = vmmov 0   ;;  %vm196_vm4 = vcmask 64512  }
   0x9   :  { %1898 = vmatprep.subr.mxu1 %v2108_v24  ;;  %1900 = vmatprep.mubr.msk.f32.mxu1 %vm2111_vm3, %v2108_v24  ;;  %s2112_s4 = smov 96   ;;  %s2113_s20 = smov 8   ;;  %v140_v41 = vshrl.u32 %v139_v40, 7  ;;  %v142_v42 = vand.u32 127, %v139_v40  ;;  %vm916_vm6 = vcmask 130048   ;;  %vm918_vm7 = vcmask 195584  }
   0xa   :  { %s2114_s21 = smov 80   ;;  %s2115_s22 = smov 84  }
   0xb   :  { %vm2273_vm5 = vcmp.le.s32.totalorder %v142_v42, %v140_v41  ;;  %s2116_s23 = smov 108   ;;  %s2117_s24 = smov 120  }
   0xc   :  { %s2118_s25 = smov 40   ;;  %s2119_s26 = smov 16  }
   0xd   :  { %2000 = vmatpush3.bf16.xpose.msk.msra.mxu0 %vm2168_vm1, %v1995_v6  ;;  %s2120_s27 = smov 88   ;;  %s2121_s28 = smov 112  }
   0xe   :  { %2003 = vmatprep.subr.msk.bf16.mxu0 %vm2168_vm1, %v2001_v11  ;;  %s2122_s29 = smov 24   ;;  %s2123_s6 = smov 72  }
   0xf   :  { %s2124_s7 = smov 104  }
  0x15   :  { %2006 = vmatpush3.bf16.xpose.msk.msra.mxu0 %vm2168_vm1, %v2001_v11 }
  0x16   :  { %2009 = vmatprep.subr.msk.bf16.mxu0 %vm2168_vm1, %v2007_v14 }
  0x1d   :  { %2012 = vmatpush3.bf16.xpose.msk.msra.mxu0 %vm2168_vm1, %v2007_v14 }
  0x1e   :  { %1958 = vmatprep.subr.mxu0 %v2108_v24 }
  0x24   :  { %1896 = vmatmul.mubr.msk.f32.vlgmr.msra.gmra.mrb[0].mxu0 %vm31_vm0, %v22_v15 }
  0x25   :  { %1960 = vmatprep.mubr.msk.f32.mxu0 %vm2111_vm3, %v2108_v24 }
  0x79   :  { %v2249_v25 = vpop.permute.xlu1 %156 }
  0xf7   :  { %v2218_v16 = vpop.f32.mrb[0].mxu0 }
  0xf8   :  { %v2220_v17 = vpop.f32.mrb[1].mxu0 }
  0xf9   :  { %v2223_v18 = vsub.f32 0.0, %v2220_v17  ;;  %v159_v26 = vmul.f32 %v2249_v25, %v2220_v17  ;;  %v190_v33 = vmul.f32 %v2183_v8, %v2220_v17 }
  0xfb   :  { %146 = vrot.lane.b32.xlu0 %v2223_v18, %s2105_s1 }
  0xff   :  { %150 = vrot.lane.b32.xlu0 %v2220_v17, %s2106_s15 }
 0x103   :  { %183 = vrot.lane.b32.xlu0 %v2223_v18, %s2107_s16 }
 0x16d   :  { %v147_v19 = vpop.permute.xlu0 %146 }
 0x171   :  { %v151_v21 = vpop.permute.xlu0 %150 }
 0x172   :  { %v154_v22 = vsel %vm153_vm2, %v147_v19, %v151_v21 }
 0x173   :  { %v160_v23 = vmul.f32 %v154_v22, %v2234_v20 }
 0x175   :  { %162 = vrot.lane.b32.xlu1 %v160_v23, %s2104_s30  ;;  %v184_v30 = vpop.permute.xlu0 %183 }
 0x179   :  { %186 = vrot.lane.b32.xlu1 %v2220_v17, %s2109_s18 }
 0x17d   :  { %361 = vrot.lane.b32.xlu1 %v2223_v18, %s2110_s19 }
 0x1e7   :  { %v163_v27 = vpop.permute.xlu1 %162 }
 0x1e8   :  { %v165_v28 = vadd.f32 %v163_v27, %v159_v26 }
 0x1ea   :  { %194 = vrot.lane.b32.xlu0 %v165_v28, %s2112_s4 }
 0x1eb   :  { %v187_v29 = vpop.permute.xlu1 %186 }
 0x1ec   :  { %v189_v31 = vsel %vm153_vm2, %v184_v30, %v187_v29 }
 0x1ed   :  { %v191_v32 = vmul.f32 %v189_v31, %v2234_v20 }
 0x1ee   :  { %364 = vrot.lane.b32.xlu0 %v2220_v17, %s2107_s16 }
 0x1ef   :  { %v192_v35 = vadd.f32 %v191_v32, %v190_v33  ;;  %v362_v36 = vpop.permute.xlu1 %361 }
 0x1f2   :  { %368 = vrot.lane.b32.xlu0 %v2183_v8, %s2113_s20 }
 0x25c   :  { %v2262_v34 = vpop.permute.xlu0 %194 }
 0x25d   :  { %1899 = vmatpush3.xpose.msk.msra.mxu1 %vm196_vm4, %v2262_v34 }
 0x25e   :  { %1903 = vmatprep.subr.mxu1 %v2108_v24 }
 0x260   :  { %1901 = vmatmul.mubr.msk.f32.vlgmr.msra.gmra.mrb[0].mxu1 %vm196_vm4, %v192_v35  ;;  %v365_v37 = vpop.permute.xlu0 %364 }
 0x261   :  { %v367_v38 = vsel %vm153_vm2, %v362_v36, %v365_v37  ;;  %1905 = vmatprep.mubr.msk.f32.mxu1 %vm2111_vm3, %v2108_v24 }
 0x262   :  { %v372_v39 = vmul.f32 %v367_v38, %v2234_v20 }
 0x264   :  { %374 = vrot.lane.b32.xlu0 %v372_v39, %s2113_s20  ;;  %v2290_v55 = vpop.permute.xlu0 %368 }
 0x265   :  { %v371_v57 = vmul.f32 %v2290_v55, %v2220_v17 }
 0x2d6   :  { %v375_v56 = vpop.permute.xlu0 %374 }
 0x2d7   :  { %v377_v58 = vadd.f32 %v375_v56, %v371_v57 }
 0x333   :  { %v268_v43 = vpop.f32.mrb[0].mxu1 }
 0x334   :  { %v272_v45 = vmul.f32 0.35355338, %v268_v43  ;;  %v1902_v46 = vpop.f32.mrb[1].mxu1 }
 0x336   :  { %v273_v47 = vsel %vm2273_vm5, %v272_v45, -1e+09 }
 0x337   :  { %v274_v48 = vsel %vm196_vm4, %v273_v47, -inf }
 0x338   :  { %275 = vmax.xlane.f32.xlu1 %v274_v48 }
 0x349   :  { %285 = vrot.lane.b32.xlu1 %v2220_v17, %s2114_s21 }
 0x34d   :  { %166 = vrot.lane.b32.xlu1 %v2223_v18, %s2115_s22 }
 0x351   :  { %169 = vrot.lane.b32.xlu1 %v2220_v17, %s2105_s1 }
 0x355   :  { %539 = vrot.lane.b32.xlu1 %v2223_v18, %s2116_s23 }
 0x3c5   :  { %v276_v49 = vpop.xlane.xlu1 %275 }
 0x3c6   :  { %v277_v50 = vsub.f32 %v273_v47, %v276_v49 }
 0x3c8   :  { %v278_v51 = vmul.f32 1.442695, %v277_v50 }
 0x3c9   :  { %v286_v52 = vpop.permute.xlu1 %285 }
 0x3ca   :  { %2048 = vpow2.f32 %v278_v51  ;;  %1904 = vmatpush3.msra.mxu1 %v286_v52 }
 0x3cb   :  { %1908 = vmatprep.subr.mxu1 %v2108_v24 }
 0x3cd   :  { %v167_v59 = vpop.permute.xlu1 %166 }
 0x3d1   :  { %v170_v60 = vpop.permute.xlu1 %169 }
 0x3d2   :  { %v172_v61 = vsel %vm153_vm2, %v167_v59, %v170_v60 }
 0x3d3   :  { %v177_v62 = vmul.f32 %v172_v61, %v2234_v20 }
 0x3d4   :  { %v2049_v53 = vpop.eup %2048 }
 0x3d5   :  { %v280_v54 = vsel %vm196_vm4, %v2049_v53, 0.0  ;;  %v540_v1 = vpop.permute.xlu1 %539 }
 0x3d6   :  { %281 = vadd.xlane.f32.xlu0 %v280_v54  ;;  %v2364_v54 = vsub.f32 0.0, %v2218_v16 }
 0x3ec   :  { %379 = vrot.lane.b32.xlu0 %v377_v58, %s2117_s24 }
 0x3f0   :  { %542 = vrot.lane.b32.xlu0 %v2220_v17, %s2110_s19 }
 0x3f4   :  { %173 = vrot.lane.b32.xlu0 %v2183_v8, %s2118_s25 }
 0x3f8   :  { %179 = vrot.lane.b32.xlu0 %v177_v62, %s2118_s25 }
 0x3fc   :  { %546 = vrot.lane.b32.xlu0 %v2183_v8, %s2119_s26 }
 0x463   :  { %v282_v63 = vpop.xlane.xlu0 %281 }
 0x464   :  { %2050 = vrcp.f32 %v282_v63 }
 0x467   :  { %v380_v0 = vpop.permute.xlu0 %379 }
 0x46b   :  { %v543_v2 = vpop.permute.xlu0 %542 }
 0x46c   :  { %v545_v3 = vsel %vm153_vm2, %v540_v1, %v543_v2 }
 0x46d   :  { %v550_v5 = vmul.f32 %v545_v3, %v2234_v20 }
 0x46e   :  { %v2051_v6 = vpop.eup %2050 }
 0x46f   :  { %v284_v7 = vmul.f32 %v2051_v6, %v2049_v53  ;;  %552 = vrot.lane.b32.xlu0 %v550_v5, %s2119_s26  ;;  %v174_v9 = vpop.permute.xlu0 %173 }
 0x470   :  { %v2308_v10 = vmul.f32 %v2218_v16, %v174_v9  ;;  %v176_v23 = vmul.f32 %v174_v9, %v2220_v17 }
 0x471   :  { %1906 = vmatmul.mubr.msk.f32.vlgmr.msra.gmra.mrb[2].mxu1 %vm196_vm4, %v284_v7 }
 0x472   :  { %1909 = vmatpush3.xpose.msk.msra.mxu1 %vm196_vm4, %v2262_v34  ;;  %1910 = vmatprep.mubr.msk.f32.mxu1 %vm2111_vm3, %v2108_v24 }
 0x473   :  { %1913 = vmatprep.subr.mxu1 %v2108_v24  ;;  %v180_v22 = vpop.permute.xlu0 %179 }
 0x474   :  { %v182_v26 = vadd.f32 %v180_v22, %v176_v23 }
 0x475   :  { %1911 = vmatmul.mubr.msk.f32.vlgmr.msra.gmra.mrb[4].mxu1 %vm196_vm4, %v380_v0 }
 0x476   :  { %1914 = vmatpush3.msra.mxu1 %v286_v52  ;;  %1915 = vmatprep.mubr.msk.f32.mxu1 %vm2111_vm3, %v2108_v24 }
 0x477   :  { %1918 = vmatprep.subr.mxu1 %v2108_v24  ;;  %v2334_v33 = vpop.permute.xlu0 %546 }
 0x4e1   :  { %v553_v35 = vpop.permute.xlu0 %552 }
 0x544   :  { %v2320_v11 = vpop.f32.mrb[2].mxu1 }
 0x545   :  { %v1907_v12 = vpop.f32.mrb[3].mxu1 }
 0x548   :  { %v449_v13 = vpop.f32.mrb[4].mxu1 }
 0x549   :  { %v453_v14 = vmul.f32 0.35355338, %v449_v13  ;;  %v1912_v15 = vpop.f32.mrb[5].mxu1 }
 0x54b   :  { %v454_v19 = vsel %vm2273_vm5, %v453_v14, -1e+09 }
 0x54c   :  { %v455_v21 = vsel %vm196_vm4, %v454_v19, -inf }
 0x54d   :  { %456 = vmax.xlane.f32.xlu1 %v455_v21 }
 0x55e   :  { %560 = vrot.lane.b32.xlu1 %v182_v26, %s2120_s27  ;;  %v930_v26 = vmul.f32 %v2218_v16, %v2249_v25 }
 0x562   :  { %725 = vrot.lane.b32.xlu1 %v2223_v18, %s2106_s15  ;;  %v549_v18 = vmul.f32 %v2334_v33, %v2220_v17 }
 0x564   :  { %v555_v36 = vadd.f32 %v553_v35, %v549_v18 }
 0x566   :  { %728 = vrot.lane.b32.xlu1 %v2220_v17, %s2116_s23 }
 0x5da   :  { %v457_v27 = vpop.xlane.xlu1 %456 }
 0x5db   :  { %v458_v28 = vsub.f32 %v454_v19, %v457_v27 }
 0x5dd   :  { %v459_v29 = vmul.f32 1.442695, %v458_v28 }
 0x5de   :  { %v2332_v32 = vpop.permute.xlu1 %560 }
 0x5df   :  { %2052 = vpow2.f32 %v459_v29 }
 0x5e2   :  { %v726_v34 = vpop.permute.xlu1 %725 }
 0x5e6   :  { %v729_v37 = vpop.permute.xlu1 %728 }
 0x5e7   :  { %v731_v38 = vsel %vm153_vm2, %v726_v34, %v729_v37 }
 0x5e8   :  { %v736_v39 = vmul.f32 %v731_v38, %v2234_v20 }
 0x5e9   :  { %v2053_v30 = vpop.eup %2052 }
 0x5ea   :  { %v461_v31 = vsel %vm196_vm4, %v2053_v30, 0.0 }
 0x5eb   :  { %462 = vadd.xlane.f32.xlu0 %v461_v31 }
 0x601   :  { %557 = vrot.lane.b32.xlu0 %v555_v36, %s2121_s28 }
 0x605   :  { %732 = vrot.lane.b32.xlu0 %v2183_v8, %s2122_s29 }
 0x609   :  { %738 = vrot.lane.b32.xlu0 %v736_v39, %s2122_s29 }
 0x678   :  { %v463_v40 = vpop.xlane.xlu0 %462 }
 0x679   :  { %2054 = vrcp.f32 %v463_v40 }
 0x67c   :  { %v558_v41 = vpop.permute.xlu0 %557 }
 0x680   :  { %v733_v42 = vpop.permute.xlu0 %732 }
 0x681   :  { %v2345_v43 = vmul.f32 %v2218_v16, %v733_v42  ;;  %v735_v0 = vmul.f32 %v733_v42, %v2220_v17 }
 0x683   :  { %v2055_v45 = vpop.eup %2054 }
 0x684   :  { %v465_v46 = vmul.f32 %v2055_v45, %v2053_v30  ;;  %v739_v63 = vpop.permute.xlu0 %738 }
 0x685   :  { %v741_v2 = vadd.f32 %v739_v63, %v735_v0 }
 0x686   :  { %1916 = vmatmul.mubr.msk.f32.vlgmr.msra.gmra.mrb[6].mxu1 %vm196_vm4, %v465_v46 }
 0x687   :  { %1919 = vmatpush3.xpose.msk.msra.mxu1 %vm196_vm4, %v2332_v32  ;;  %1920 = vmatprep.mubr.msk.f32.mxu1 %vm2111_vm3, %v2108_v24 }
 0x688   :  { %1923 = vmatprep.subr.mxu1 %v2108_v24 }
 0x68a   :  { %1921 = vmatmul.mubr.msk.f32.vlgmr.msra.gmra.mrb[8].mxu1 %vm196_vm4, %v558_v41 }
 0x68b   :  { %1925 = vmatprep.mubr.msk.f32.mxu1 %vm2111_vm3, %v2108_v24 }
 0x759   :  { %v2356_v47 = vpop.f32.mrb[6].mxu1 }
 0x75a   :  { %v1917_v48 = vpop.f32.mrb[7].mxu1 }
 0x75d   :  { %v632_v49 = vpop.f32.mrb[8].mxu1 }
 0x75e   :  { %v636_v50 = vmul.f32 0.35355338, %v632_v49  ;;  %v1922_v51 = vpop.f32.mrb[9].mxu1 }
 0x760   :  { %v637_v52 = vsel %vm2273_vm5, %v636_v50, -1e+09 }
 0x761   :  { %v638_v53 = vsel %vm196_vm4, %v637_v52, -inf }
 0x762   :  { %639 = vmax.xlane.f32.xlu1 %v638_v53 }
 0x773   :  { %649 = vrot.lane.b32.xlu1 %v2220_v17, %s2123_s6 }
 0x777   :  { %922 = vrot.lane.b32.xlu1 %v2364_v54, %s2105_s1 }
 0x77b   :  { %926 = vrot.lane.b32.xlu1 %v2218_v16, %s2106_s15 }
 0x7ef   :  { %v640_v56 = vpop.xlane.xlu1 %639 }
 0x7f0   :  { %v641_v57 = vsub.f32 %v637_v52, %v640_v56  ;;  %v958_v52 = vmul.f32 %v2218_v16, %v2183_v8 }
 0x7f2   :  { %v642_v58 = vmul.f32 1.442695, %v641_v57 }
 0x7f3   :  { %v650_v59 = vpop.permute.xlu1 %649 }
 0x7f4   :  { %2056 = vpow2.f32 %v642_v58  ;;  %1924 = vmatpush3.msra.mxu1 %v650_v59 }
 0x7f5   :  { %1928 = vmatprep.subr.mxu1 %v2108_v24 }
 0x7f7   :  { %v923_v62 = vpop.permute.xlu1 %922 }
 0x7fb   :  { %v927_v1 = vpop.permute.xlu1 %926 }
 0x7fc   :  { %v929_v3 = vsel %vm153_vm2, %v923_v62, %v927_v1 }
 0x7fd   :  { %v931_v5 = vmul.f32 %v929_v3, %v2234_v20 }
 0x7fe   :  { %v2057_v60 = vpop.eup %2056 }
 0x7ff   :  { %v644_v61 = vsel %vm196_vm4, %v2057_v60, 0.0 }
 0x800   :  { %645 = vadd.xlane.f32.xlu0 %v644_v61 }
 0x816   :  { %743 = vrot.lane.b32.xlu0 %v741_v2, %s2124_s7 }
 0x81a   :  { %933 = vrot.lane.b32.xlu0 %v931_v5, %s2104_s30 }
 0x88d   :  { %v646_v6 = vpop.xlane.xlu0 %645 }
 0x88e   :  { %2058 = vrcp.f32 %v646_v6  ;;  %v1135_v6 = vmul.f32 %v2218_v16, %v2290_v55 }
 0x891   :  { %v744_v17 = vpop.permute.xlu0 %743 }
 0x895   :  { %v934_v23 = vpop.permute.xlu0 %933 }
 0x896   :  { %v936_v27 = vadd.f32 %v934_v23, %v930_v26 }
 0x898   :  { %v2059_v7 = vpop.eup %2058 }
 0x899   :  { %v648_v9 = vmul.f32 %v2059_v7, %v2057_v60 }
 0x89b   :  { %1926 = vmatmul.mubr.msk.f32.vlgmr.msra.gmra.mrb[10].mxu1 %vm196_vm4, %v648_v9 }
 0x89c   :  { %1929 = vmatpush3.xpose.msk.msra.mxu1 %vm196_vm4, %v2332_v32  ;;  %1930 = vmatprep.mubr.msk.f32.mxu1 %vm2111_vm3, %v2108_v24 }
 0x89d   :  { %1933 = vmatprep.subr.mxu1 %v2108_v24 }
 0x89f   :  { %1931 = vmatmul.mubr.msk.f32.vlgmr.msra.gmra.mrb[12].mxu1 %vm196_vm4, %v744_v17 }
 0x8a0   :  { %1934 = vmatpush3.msra.mxu1 %v650_v59  ;;  %1935 = vmatprep.mubr.msk.f32.mxu1 %vm2111_vm3, %v2108_v24 }
 0x8a1   :  { %1938 = vmatprep.subr.mxu1 %v2108_v24 }
 0x96e   :  { %v2387_v12 = vpop.f32.mrb[10].mxu1 }
 0x96f   :  { %v1927_v13 = vpop.f32.mrb[11].mxu1 }
 0x970   :  { %v1310_v13 = vmul.f32 %v2218_v16, %v2334_v33 }
 0x972   :  { %v813_v14 = vpop.f32.mrb[12].mxu1 }
 0x973   :  { %v817_v15 = vmul.f32 0.35355338, %v813_v14  ;;  %v1932_v19 = vpop.f32.mrb[13].mxu1 }
 0x975   :  { %v818_v21 = vsel %vm2273_vm5, %v817_v15, -1e+09 }
 0x976   :  { %v819_v22 = vsel %vm196_vm4, %v818_v21, -inf }
 0x977   :  { %820 = vmax.xlane.f32.xlu1 %v819_v22 }
 0x988   :  { %951 = vrot.lane.b32.xlu1 %v2364_v54, %s2107_s16 }
 0x98c   :  { %962 = vrot.lane.b32.xlu1 %v936_v27, %s2112_s4 }
 0x990   :  { %1128 = vrot.lane.b32.xlu1 %v2364_v54, %s2110_s19 }
 0x994   :  { %1131 = vrot.lane.b32.xlu1 %v2218_v16, %s2107_s16 }
 0x998   :  { %937 = vrot.lane.b32.xlu1 %v2364_v54, %s2115_s22 }
 0xa04   :  { %v821_v28 = vpop.xlane.xlu1 %820 }
 0xa05   :  { %v822_v29 = vsub.f32 %v818_v21, %v821_v28 }
 0xa07   :  { %v823_v30 = vmul.f32 1.442695, %v822_v29 }
 0xa08   :  { %v952_v32 = vpop.permute.xlu1 %951 }
 0xa09   :  { %2060 = vpow2.f32 %v823_v30 }
 0xa0c   :  { %v2406_v34 = vpop.permute.xlu1 %962 }
 0xa10   :  { %v1129_v35 = vpop.permute.xlu1 %1128 }
 0xa13   :  { %v2061_v25 = vpop.eup %2060 }
 0xa14   :  { %v825_v31 = vsel %vm196_vm4, %v2061_v25, 0.0  ;;  %v1132_v18 = vpop.permute.xlu1 %1131 }
 0xa15   :  { %826 = vadd.xlane.f32.xlu0 %v825_v31  ;;  %v1134_v36 = vsel %vm153_vm2, %v1129_v35, %v1132_v18 }
 0xa16   :  { %v1136_v37 = vmul.f32 %v1134_v36, %v2234_v20 }
 0xa18   :  { %v938_v40 = vpop.permute.xlu1 %937 }
 0xa2b   :  { %954 = vrot.lane.b32.xlu0 %v2218_v16, %s2109_s18 }
 0xa2f   :  { %940 = vrot.lane.b32.xlu0 %v2218_v16, %s2105_s1 }
 0xa33   :  { %1303 = vrot.lane.b32.xlu0 %v2364_v54, %s2116_s23 }
 0xa37   :  { %1306 = vrot.lane.b32.xlu0 %v2218_v16, %s2110_s19 }
 0xa3b   :  { %1486 = vrot.lane.b32.xlu0 %v2364_v54, %s2106_s15 }
 0xa3f   :  { %1489 = vrot.lane.b32.xlu0 %v2218_v16, %s2116_s23 }
 0xa43   :  { %1138 = vrot.lane.b32.xlu0 %v1136_v37, %s2113_s20 }
 0xaa2   :  { %v827_v38 = vpop.xlane.xlu0 %826 }
 0xaa3   :  { %2062 = vrcp.f32 %v827_v38 }
 0xaa6   :  { %v955_v39 = vpop.permute.xlu0 %954 }
 0xaa7   :  { %v957_v42 = vsel %vm153_vm2, %v952_v32, %v955_v39 }
 0xaa8   :  { %v959_v50 = vmul.f32 %v957_v42, %v2234_v20 }
 0xaaa   :  { %v941_v41 = vpop.permute.xlu0 %940  ;;  %v960_v53 = vadd.f32 %v959_v50, %v958_v52 }
 0xaab   :  { %v943_v45 = vsel %vm153_vm2, %v938_v40, %v941_v41 }
 0xaac   :  { %v945_v46 = vmul.f32 %v943_v45, %v2234_v20 }
 0xaad   :  { %v2063_v48 = vpop.eup %2062 }
 0xaae   :  { %v829_v49 = vmul.f32 %v2063_v48, %v2061_v25  ;;  %947 = vrot.lane.b32.xlu0 %v945_v46, %s2118_s25  ;;  %v1304_v51 = vpop.permute.xlu0 %1303 }
 0xab0   :  { %1936 = vmatmul.mubr.msk.f32.vlgmr.msra.gmra.mrb[14].mxu1 %vm196_vm4, %v829_v49 }
 0xab1   :  { %1939 = vmatpush3.xpose.msk.msra.mxu1 %vm196_vm4, %v2406_v34  ;;  %1940 = vmatprep.mubr.msk.f32.mxu1 %vm2111_vm3, %v2108_v24 }
 0xab2   :  { %v1307_v54 = vpop.permute.xlu0 %1306  ;;  %1943 = vmatprep.subr.mxu1 %v2108_v24 }
 0xab3   :  { %v1309_v56 = vsel %vm153_vm2, %v1304_v51, %v1307_v54 }
 0xab4   :  { %v1311_v57 = vmul.f32 %v1309_v56, %v2234_v20  ;;  %1941 = vmatmul.mubr.msk.f32.vlgmr.msra.gmra.mrb[16].mxu1 %vm196_vm4, %v960_v53 }
 0xab5   :  { %1945 = vmatprep.mubr.msk.f32.mxu1 %vm2111_vm3, %v2108_v24 }
 0xab6   :  { %1313 = vrot.lane.b32.xlu0 %v1311_v57, %s2119_s26  ;;  %v1487_v8 = vpop.permute.xlu0 %1486 }
 0xaba   :  { %v1490_v58 = vpop.permute.xlu0 %1489 }
 0xabb   :  { %v1492_v59 = vsel %vm153_vm2, %v1487_v8, %v1490_v58 }
 0xabc   :  { %v1494_v60 = vmul.f32 %v1492_v59, %v2234_v20 }
 0xabe   :  { %1496 = vrot.lane.b32.xlu0 %v1494_v60, %s2122_s29  ;;  %v1139_v5 = vpop.permute.xlu0 %1138 }
 0xabf   :  { %v1141_v20 = vadd.f32 %v1139_v5, %v1135_v6 }
 0xb20   :  { %v948_v7 = vpop.permute.xlu0 %947 }
 0xb21   :  { %v950_v9 = vadd.f32 %v948_v7, %v2308_v10 }
 0xb28   :  { %v1314_v17 = vpop.permute.xlu0 %1313 }
 0xb29   :  { %v1316_v14 = vadd.f32 %v1314_v17, %v1310_v13 }
 0xb30   :  { %v1497_v15 = vpop.permute.xlu0 %1496 }
 0xb31   :  { %v1499_v55 = vadd.f32 %v1497_v15, %v2345_v43 }
 0xb83   :  { %v2443_v61 = vpop.f32.mrb[14].mxu1 }
 0xb84   :  { %v1937_v62 = vpop.f32.mrb[15].mxu1 }
 0xb87   :  { %v1035_v63 = vpop.f32.mrb[16].mxu1 }
 0xb88   :  { %v1039_v0 = vmul.f32 0.35355338, %v1035_v63  ;;  %v1942_v1 = vpop.f32.mrb[17].mxu1 }
 0xb8a   :  { %v1040_v2 = vsel %vm2273_vm5, %v1039_v0, -1e+09 }
 0xb8b   :  { %v1041_v3 = vsel %vm196_vm4, %v1040_v2, -inf }
 0xb8c   :  { %1042 = vmax.xlane.f32.xlu1 %v1041_v3 }
 0xb9d   :  { %1052 = vrot.lane.b32.xlu1 %v2218_v16, %s2114_s21 }
 0xba1   :  { %1143 = vrot.lane.b32.xlu1 %v1141_v20, %s2117_s24 }
 0xba5   :  { %1321 = vrot.lane.b32.xlu1 %v950_v9, %s2120_s27 }
 0xba9   :  { %1318 = vrot.lane.b32.xlu1 %v1316_v14, %s2121_s28 }
 0xbad   :  { %1501 = vrot.lane.b32.xlu1 %v1499_v55, %s2124_s7  ;;  %v1676_v55 = vld [vmem:[%s2559_s2] sm:$0xff] }
 0xc19   :  { %v1043_v19 = vpop.xlane.xlu1 %1042 }
 0xc1a   :  { %v1044_v21 = vsub.f32 %v1040_v2, %v1043_v19  ;;  %v1677_v19 = vld [vmem:[%s2559_s2 + $0x8] sm:$0xff] }
 0xc1c   :  { %v1045_v22 = vmul.f32 1.442695, %v1044_v21  ;;  %v2013_v21 = vpack.c.bf16 %v1677_v19, %v1676_v55 }
 0xc1d   :  { %v1053_v23 = vpop.permute.xlu1 %1052 }
 0xc1e   :  { %2064 = vpow2.f32 %v1045_v22  ;;  %1944 = vmatpush3.msra.mxu1 %v1053_v23  ;;  %v1679_v22 = vld [vmem:[%s2559_s2 + $0x18] sm:$0xff] }
 0xc1f   :  { %1948 = vmatprep.subr.mxu1 %v2108_v24 }
 0xc21   :  { %v1144_v10 = vpop.permute.xlu1 %1143 }
 0xc25   :  { %v1322_v33 = vpop.permute.xlu1 %1321 }
 0xc26   :  { %1959 = vmatpush3.xpose.msk.msra.mxu0 %vm196_vm4, %v1322_v33 }
 0xc27   :  { %1968 = vmatprep.subr.mxu0 %v2108_v24 }
 0xc28   :  { %v2065_v26 = vpop.eup %2064 }
 0xc29   :  { %v1319_v27 = vpop.permute.xlu1 %1318  ;;  %v1047_v43 = vsel %vm196_vm4, %v2065_v26, 0.0 }
 0xc2a   :  { %1048 = vadd.xlane.f32.xlu0 %v1047_v43  ;;  %1961 = vmatmul.mubr.msk.f32.vlgmr.msra.gmra.mrb[2].mxu0 %vm196_vm4, %v1319_v27 }
 0xc2b   :  { %1969 = vmatpush3.xpose.msk.msra.mxu0 %vm196_vm4, %v1322_v33  ;;  %1970 = vmatprep.mubr.msk.f32.mxu0 %vm2111_vm3, %v2108_v24 }
 0xc2c   :  { %2015 = vmatprep.subr.msk.bf16.mxu0 %vm2168_vm1, %v2013_v21 }
 0xc2d   :  { %v1502_v28 = vpop.permute.xlu1 %1501 }
 0xc2e   :  { %1971 = vmatmul.mubr.msk.f32.vlgmr.msra.gmra.mrb[4].mxu0 %vm196_vm4, %v1502_v28 }
 0xc2f   :  { %2018 = vmatpush3.bf16.xpose.msk.msra.mxu0 %vm2168_vm1, %v2013_v21 }
 0xcb7   :  { %v1049_v29 = vpop.xlane.xlu0 %1048 }
 0xcb8   :  { %2066 = vrcp.f32 %v1049_v29 }
 0xcc2   :  { %v2067_v30 = vpop.eup %2066 }
 0xcc3   :  { %v1051_v25 = vmul.f32 %v2067_v30, %v2065_v26 }
 0xcc5   :  { %1946 = vmatmul.mubr.msk.f32.vlgmr.msra.gmra.mrb[18].mxu1 %vm196_vm4, %v1051_v25 }
 0xcc6   :  { %1949 = vmatpush3.xpose.msk.msra.mxu1 %vm196_vm4, %v2406_v34  ;;  %1950 = vmatprep.mubr.msk.f32.mxu1 %vm2111_vm3, %v2108_v24 }
 0xcc7   :  { %1953 = vmatprep.subr.mxu1 %v2108_v24 }
 0xcc9   :  { %1951 = vmatmul.mubr.msk.f32.vlgmr.msra.gmra.mrb[20].mxu1 %vm196_vm4, %v1144_v10 }
 0xcca   :  { %1954 = vmatpush3.msra.mxu1 %v1053_v23  ;;  %1955 = vmatprep.mubr.msk.f32.mxu1 %vm2111_vm3, %v2108_v24 }
 0xccb   :  { %1963 = vmatprep.subr.mxu1 %v2108_v24 }
 0xcfd   :  { %v1393_v31 = vpop.f32.mrb[2].mxu0 }
 0xcfe   :  { %v1397_v32 = vmul.f32 0.35355338, %v1393_v31  ;;  %v1962_v35 = vpop.f32.mrb[3].mxu0 }
 0xd00   :  { %v1398_v18 = vsel %vm2273_vm5, %v1397_v32, -1e+09 }
 0xd01   :  { %v1571_v34 = vpop.f32.mrb[4].mxu0  ;;  %v1399_v36 = vsel %vm196_vm4, %v1398_v18, -inf }
 0xd02   :  { %1400 = vmax.xlane.f32.xlu1 %v1399_v36  ;;  %v1972_v37 = vpop.f32.mrb[5].mxu0  ;;  %v1575_v46 = vmul.f32 0.35355338, %v1571_v34 }
 0xd13   :  { %904 = vrot.lane.b32.xlu1 %v2356_v47, %s2113_s20  ;;  %v1576_v47 = vsel %vm2273_vm5, %v1575_v46, -1e+09 }
 0xd14   :  { %v1577_v52 = vsel %vm196_vm4, %v1576_v47, -inf }
 0xd8f   :  { %v1401_v38 = vpop.xlane.xlu1 %1400 }
 0xd90   :  { %v1402_v39 = vsub.f32 %v1398_v18, %v1401_v38 }
 0xd92   :  { %v1403_v40 = vmul.f32 1.442695, %v1402_v39 }
 0xd93   :  { %v905_v6 = vpop.permute.xlu1 %904 }
 0xd94   :  { %2068 = vpow2.f32 %v1403_v40 }
 0xd98   :  { %v2484_v41 = vpop.f32.mrb[18].mxu1 }
 0xd99   :  { %v1947_v42 = vpop.f32.mrb[19].mxu1 }
 0xd9c   :  { %v1213_v45 = vpop.f32.mrb[20].mxu1 }
 0xd9d   :  { %v1217_v48 = vmul.f32 0.35355338, %v1213_v45  ;;  %v1952_v49 = vpop.f32.mrb[21].mxu1 }
 0xd9e   :  { %v2069_v53 = vpop.eup %2068 }
 0xd9f   :  { %v1218_v50 = vsel %vm2273_vm5, %v1217_v48, -1e+09  ;;  %v1405_v54 = vsel %vm196_vm4, %v2069_v53, 0.0 }
 0xda0   :  { %v1219_v51 = vsel %vm196_vm4, %v1218_v50, -inf }
 0xda1   :  { %1220 = vmax.xlane.f32.xlu0 %v1219_v51 }
 0xda5   :  { %1578 = vmax.xlane.f32.xlu0 %v1577_v52 }
 0xda9   :  { %1406 = vadd.xlane.f32.xlu0 %v1405_v54 }
 0xe2e   :  { %v1221_v56 = vpop.xlane.xlu0 %1220 }
 0xe2f   :  { %v1222_v57 = vsub.f32 %v1218_v50, %v1221_v56 }
 0xe31   :  { %v1223_v59 = vmul.f32 1.442695, %v1222_v57 }
 0xe32   :  { %v1579_v8 = vpop.xlane.xlu0 %1578 }
 0xe33   :  { %v1580_v58 = vsub.f32 %v1576_v47, %v1579_v8 }
 0xe35   :  { %v1581_v60 = vmul.f32 1.442695, %v1580_v58 }
 0xe36   :  { %v1407_v1 = vpop.xlane.xlu0 %1406 }
 0xe37   :  { %2070 = vpow2.f32 %v1581_v60 }
 0xe38   :  { %2072 = vpow2.f32 %v1223_v59 }
 0xe41   :  { %v2071_v62 = vpop.eup %2070 }
 0xe42   :  { %v1583_v63 = vsel %vm196_vm4, %v2071_v62, 0.0  ;;  %v2073_v44 = vpop.eup %2072 }
 0xe43   :  { %1584 = vadd.xlane.f32.xlu0 %v1583_v63  ;;  %v1225_v0 = vsel %vm196_vm4, %v2073_v44, 0.0 }
 0xe47   :  { %1226 = vadd.xlane.f32.xlu0 %v1225_v0 }
 0xe5d   :  { %1410 = vrot.lane.b32.xlu0 %v2218_v16, %s2123_s6  ;;  %v915_v16 = vsel %vm196_vm4, %v2320_v11, %v905_v6 }
 0xe61   :  { %908 = vrot.lane.b32.xlu0 %v2387_v12, %s2119_s26 }
 0xe65   :  { %912 = vrot.lane.b32.xlu0 %v2443_v61, %s2122_s29 }
 0xed0   :  { %v1585_v2 = vpop.xlane.xlu0 %1584 }
 0xed4   :  { %v1227_v3 = vpop.xlane.xlu0 %1226 }
 0xed5   :  { %2074 = vrcp.f32 %v1227_v3 }
 0xed6   :  { %2076 = vrcp.f32 %v1407_v1 }
 0xed7   :  { %2078 = vrcp.f32 %v1585_v2 }
 0xed8   :  { %v1411_v5 = vpop.permute.xlu0 %1410 }
 0xedc   :  { %v909_v20 = vpop.permute.xlu0 %908 }
 0xedd   :  { %v917_v12 = vsel %vm916_vm6, %v915_v16, %v909_v20 }
 0xedf   :  { %v2075_v7 = vpop.eup %2074 }
 0xee0   :  { %v1229_v9 = vmul.f32 %v2075_v7, %v2073_v44  ;;  %v913_v17 = vpop.permute.xlu0 %912  ;;  %v2077_v61 = vpop.eup %2076 }
 0xee1   :  { %v919_v13 = vsel %vm918_vm7, %v917_v12, %v913_v17  ;;  %v1409_v14 = vmul.f32 %v2077_v61, %v2069_v53  ;;  %v2079_v15 = vpop.eup %2078 }
 0xee2   :  { %1956 = vmatmul.mubr.msk.f32.vlgmr.msra.gmra.mrb[22].mxu1 %vm196_vm4, %v1229_v9  ;;  %1986 = vmatprep.mubr.msk.f32.mxu0 %vm31_vm0, %v919_v13  ;;  %v1587_v11 = vmul.f32 %v2079_v15, %v2071_v62 }
 0xee3   :  { %1964 = vmatpush3.msra.mxu1 %v1411_v5  ;;  %1965 = vmatprep.mubr.msk.f32.mxu1 %vm2111_vm3, %v2108_v24 }
 0xee4   :  { %1973 = vmatprep.subr.mxu1 %v2108_v24 }
 0xee6   :  { %1966 = vmatmul.mubr.msk.f32.vlgmr.msra.gmra.mrb[24].mxu1 %vm196_vm4, %v1409_v14 }
 0xee7   :  { %1974 = vmatpush3.msra.mxu1 %v1411_v5  ;;  %1975 = vmatprep.mubr.msk.f32.mxu1 %vm2111_vm3, %v2108_v24  ;;  %v1678_v24 = vld [vmem:[%s2559_s2 + $0x10] sm:$0xff]  ;;  %s2125_s2 = smov [#allocation2]  }
 0xee8   :  { %v2019_v23 = vpack.c.bf16 %v1679_v22, %v1678_v24  ;;  %s1780_s14 = sshll.u32 %s2125_s2, 4  ;;  %s1781_s14 = int_to_ptr.vmem [resolvable:$true] %s1780_s14 }
 0xee9   :  { %s2080_s1 = scalar_lea.vmem %s1781_s14, 256  ;;  %p2085_p1 = scmp.lt.s32.totalorder %s1781_s14, %s1781_s14 }
 0xeea   :  { %1976 = vmatmul.mubr.msk.f32.vlgmr.msra.gmra.mrb[26].mxu1 %vm196_vm4, %v1587_v11  ;;  %2021 = vmatprep.subr.msk.bf16.mxu0 %vm2168_vm1, %v2019_v23  ;;  %p2081_p0 = scmp.ne.s32.totalorder %s1781_s14, %s2080_s1  ;;  %p2086_p2 = scmp.lt.s32.totalorder %s2080_s1, %s2080_s1 }
 0xeeb   :  { %2024 = vmatpush3.bf16.xpose.msk.msra.mxu0 %vm2168_vm1, %v2019_v23 }
 0xeec   :  { %p2087_p3 = por %p2086_p2, %p2085_p1 }
 0xeee   :  { %p2088_p4 = pnand %p2087_p3, %p2081_p0 }
 0xfb5   :  { %v1299_v10 = vpop.f32.mrb[22].mxu1 }
 0xfb6   :  { %1662 = vrot.lane.b32.xlu0 %v1299_v10, %s2113_s20  ;;  %v1957_v33 = vpop.f32.mrb[23].mxu1 }
 0xfb9   :  { %v1482_v26 = vpop.f32.mrb[24].mxu1 }
 0xfba   :  { %1666 = vrot.lane.b32.xlu0 %v1482_v26, %s2119_s26  ;;  %v1967_v27 = vpop.f32.mrb[25].mxu1 }
 0xfbd   :  { %v1657_v43 = vpop.f32.mrb[26].mxu1 }
 0xfbe   :  { %1670 = vrot.lane.b32.xlu1 %v1657_v43, %s2122_s29  ;;  %v1977_v28 = vpop.f32.mrb[27].mxu1 }
0x1028   :  { %v1663_v29 = vpop.permute.xlu0 %1662 }
0x1029   :  { %v1673_v25 = vsel %vm196_vm4, %v2484_v41, %v1663_v29 }
0x102c   :  { %v1667_v30 = vpop.permute.xlu0 %1666 }
0x102d   :  { %v1674_v4 = vsel %vm916_vm6, %v1673_v25, %v1667_v30 }
0x1030   :  { %v1671_v31 = vpop.permute.xlu1 %1670 }
0x1031   :  { %v1675_v32 = vsel %vm918_vm7, %v1674_v4, %v1671_v31 }
0x1032   :  { %1987 = vmatmul.mubr.msk.f32.vlgmr.msra.gmra.mrb[6].mxu0 %vm31_vm0, %v1675_v32 }
0x1105   :  { %v1988_v35 = vpop.f32.mrb[6].mxu0 }
0x1106   :  { %1774 = vst.msk [vmem:[#allocation2 + $0x8] sm:$0xff] %vm31_vm0, %v1988_v35  ;;  %v1764_v18 = vpop.f32.mrb[7].mxu0 }
0x1107   :  { %1773 = vst.msk [vmem:[#allocation2] sm:$0xff] %vm31_vm0, %v1764_v18 }
0x1108   :  { %2091 = shalt.err (!%p2088_p4)
}
0x1109   :  { %s2092_s0 = scalar_lea.hbm %s2562_s5, 256 }
0x110a   :  { %p2093_p5 = scmp.ne.s32.totalorder %s2562_s5, %s2092_s0  ;;  %p2096_p6 = scmp.lt.u32.totalorder %s2092_s0, %s2562_s5 }
0x110c   :  { %p2098_p7 = pnand %p2096_p6, %p2093_p5 }
0x110e   :  { %2101 = shalt.err (!%p2098_p7)
}
0x110f   :  { %s2126_s21 = smov 128  }
0x1110   :  { %1786 = dma.vmem_to_hbm [thread:$0]  %s1781_s14, 256, %s2562_s5, [#allocation3], %s2126_s21, %s2126_s21, %s2113_s20  }
0x1111   :  { %2102 = dma.done.wait [#allocation3], 256  }
0x1112   :  { %2103 = vsyncadd [#allocation3], 4294967040 }
0x1113   :  { %1790 = vsyncpa [#allocation3], 1 }

</bundles_post_ra>
